<compile_context>
chip_gen: v7x
topology: tpu7x:2x2x1
jax: 0.10.0
libtpu: 0.0.40
codegen_flags: <defaults>
</compile_context>

<pallas_src>
import math
import functools

import jax
import jax.numpy as jnp
from jax.experimental import pallas as pl
from jax.experimental.pallas import tpu as pltpu


# ---------------- optional single-buffering for constant (weight) blocks -----
def _make_buffered1():
    try:
        mode = pl.Buffered(buffer_count=1)
        # Probe that this JAX version's BlockSpec accepts the kwarg.
        pl.BlockSpec((8, 128), lambda i: (0, 0), pipeline_mode=mode)
        return mode
    except Exception:
        return None


_BUFFERED1 = _make_buffered1()


def _const_spec(shape):
    """Full-array block with a constant index map (weights / biases)."""
    index_map = lambda b: (0,) * len(shape)
    if _BUFFERED1 is not None:
        return pl.BlockSpec(shape, index_map, pipeline_mode=_BUFFERED1)
    return pl.BlockSpec(shape, index_map)


# ---------------------------------- math helpers -----------------------------
def _layernorm(h, gamma, beta, eps=1e-5):
    mu = jnp.mean(h, axis=-1, keepdims=True)
    d = h - mu
    var = jnp.mean(d * d, axis=-1, keepdims=True)
    return d * jax.lax.rsqrt(var + eps) * gamma + beta


def _gelu(x):
    # matches: x * 0.5 * (1 + erf(x / sqrt(2)))
    return x * 0.5 * (1.0 + jax.lax.erf(x * (1.0 / math.sqrt(2.0))))


# ------------------------------------ kernel ---------------------------------
def _block_kernel(n_head,
                  x_ref,
                  ln1g_ref, ln1b_ref, wqkv_ref, bqkv_ref, wp_ref, bp_ref,
                  ln2g_ref, ln2b_ref, w1_ref, b1_ref, w2_ref, b2_ref,
                  o_ref):
    Bb, T, C = x_ref.shape
    D = C // n_head
    BH = n_head * Bb

    # Flatten to a lane-dense (M, C) slab so every matmul sees M = Bb*T rows.
    # (Free relayout when T is a multiple of 8.)
    x = x_ref[...].reshape(Bb * T, C)

    # ---------------- attention branch ----------------
    h = _layernorm(x, ln1g_ref[0], ln1b_ref[0])

    # Single fused QKV projection (1/sqrt(D) already folded into the q columns).
    qkv = jnp.dot(h.astype(jnp.bfloat16), wqkv_ref[...],
                  preferred_element_type=jnp.float32) + bqkv_ref[0]      # (M, 3C)

    def heads(base):
        # (M, 3C) lanes [base : base+C] -> (n_head*Bb, T, D) head-major batch.
        # Built from lane slices + one leading-axis stack (no major<->sublane
        # transposes, which Mosaic does not reliably lower at these shapes).
        return jnp.stack(
            [qkv[:, base + hh * D: base + (hh + 1) * D].reshape(Bb, T, D)
             for hh in range(n_head)],
            axis=0).reshape(BH, T, D)

    q3 = heads(0).astype(jnp.bfloat16)
    k3 = heads(C).astype(jnp.bfloat16)
    v3 = heads(2 * C).astype(jnp.bfloat16)

    # Causal additive bias generated in-kernel (no (T,T) HBM input).
    row = jax.lax.broadcasted_iota(jnp.int32, (T, T), 0)
    col = jax.lax.broadcasted_iota(jnp.int32, (T, T), 1)
    # -1e30 instead of -inf: identical for a causal mask (diagonal always kept)
    # and avoids inf-inf NaNs in the rowmax subtraction.
    mask_bias = jnp.where(row >= col, jnp.float32(0.0), jnp.float32(-1e30))

    att = jnp.einsum('bqd,bkd->bqk', q3, k3,
                     preferred_element_type=jnp.float32)                 # (BH, T, T)
    att = att + mask_bias[None, :, :]
    att = att - jnp.max(att, axis=-1, keepdims=True)
    p = jnp.exp(att)
    p = p * pl.reciprocal(jnp.sum(p, axis=-1, keepdims=True), approx=True)  # EUP
    # attn_drop: identity in eval mode
    y3 = jnp.einsum('bqk,bkd->bqd', p.astype(jnp.bfloat16), v3,
                    preferred_element_type=jnp.float32)                  # (BH, T, D)

    # Back to (M, C): regroup leading dims, concatenate heads along lanes.
    y3 = y3.reshape(n_head, Bb * T, D)
    y = jnp.concatenate([y3[hh] for hh in range(n_head)], axis=-1)       # (M, C)
    y = jnp.dot(y.astype(jnp.bfloat16), wp_ref[...],
                preferred_element_type=jnp.float32) + bp_ref[0]
    # resid_drop: identity in eval mode
    x = x + y

    # ---------------- MLP branch ----------------
    h2 = _layernorm(x, ln2g_ref[0], ln2b_ref[0])
    m = jnp.dot(h2.astype(jnp.bfloat16), w1_ref[...],
                preferred_element_type=jnp.float32) + b1_ref[0]
    m = _gelu(m)
    m = jnp.dot(m.astype(jnp.bfloat16), w2_ref[...],
                preferred_element_type=jnp.float32) + b2_ref[0]
    # mlp dropout: identity in eval mode
    x = x + m

    o_ref[...] = x.reshape(Bb, T, C)


# ------------------------------------ wrapper --------------------------------
def _default_target_rows():
    """Bigger M on 128 MiB-VMEM parts (v5e/v6e); conservative elsewhere (v7x)."""
    try:
        vmem = pltpu.get_tpu_info().vmem_capacity_bytes
    except Exception:
        return 256
    return 512 if vmem >= (100 << 20) else 256


def _pick_batch_block(B, T, target_rows):
    """Largest Bb dividing B with Bb*T >= target_rows, capped so the parallel
    grid has >= 2 steps when B >= 2 (keeps both v7x TensorCores busy and the
    BlockSpec pipeline alive)."""
    bb = max(1, min(B, -(-target_rows // T)))
    if B >= 2:
        bb = min(bb, B // 2)
    bb = max(bb, 1)
    while B % bb:
        bb -= 1
    return bb


def block_forward(x, params, n_head, *, target_rows=None):
    """x: (B, T, C) f32.  The causal (lower-triangular) mask is generated in-kernel."""
    B, T, C = x.shape
    assert C % n_head == 0
    H = 4 * C
    D = C // n_head
    if target_rows is None:
        target_rows = _default_target_rows()
    Bb = _pick_batch_block(B, T, target_rows)
    grid = (B // Bb,)

    # One-time parameter prep: fuse QKV, fold the attention scale into Wq/bq,
    # ship all matmul weights as bf16 (halves weight VMEM / HBM traffic).
    scale = 1.0 / math.sqrt(D)
    wqkv = jnp.concatenate([params["wq"] * scale, params["wk"], params["wv"]],
                           axis=1).astype(jnp.bfloat16)                   # (C, 3C)
    bqkv = jnp.concatenate([params["bq"] * scale, params["bk"], params["bv"]],
                           axis=1).astype(jnp.float32)                    # (1, 3C)
    wp = params["wp"].astype(jnp.bfloat16)
    w1 = params["w1"].astype(jnp.bfloat16)
    w2 = params["w2"].astype(jnp.bfloat16)

    in_specs = [
        pl.BlockSpec((Bb, T, C), lambda b: (b, 0, 0)),     # x
        _const_spec((1, C)), _const_spec((1, C)),          # ln1 gamma / beta
        _const_spec((C, 3 * C)), _const_spec((1, 3 * C)),  # fused Wqkv / bqkv
        _const_spec((C, C)), _const_spec((1, C)),          # Wproj / bproj
        _const_spec((1, C)), _const_spec((1, C)),          # ln2 gamma / beta
        _const_spec((C, H)), _const_spec((1, H)),          # W1 / b1
        _const_spec((H, C)), _const_spec((1, C)),          # W2 / b2
    ]

    # VMEM budget from the actual footprint; capped at 56 MiB (v7x headroom).
    M = Bb * T
    weight_bytes = 2 * (3 * C * C + C * C + C * H + H * C)           # bf16
    bias_ln_bytes = 4 * (3 * C + C + H + C + 4 * C)                  # f32
    io_bytes = 2 * 2 * M * C * 4                                     # x/out, double-buffered
    act_bytes = (4 * M * (3 * C + 4 * C + 2 * H)                     # f32 intermediates
                 + 2 * M * (3 * C + 2 * C + H)                       # bf16 matmul operands
                 + (4 * 3 + 2) * Bb * n_head * T * T)                # scores / probs
    wbuf = 1 if _BUFFERED1 is not None else 2
    vmem_limit = int(min(56 << 20,
                         max(32 << 20,
                             wbuf * weight_bytes + 2 * bias_ln_bytes
                             + io_bytes + act_bytes + (4 << 20))))

    flops = (2 * B * T * C * (3 * C)            # fused QKV
             + 2 * B * T * C * C                # output projection
             + 2 * B * n_head * T * T * D * 2   # scores + prob @ V
             + 2 * B * T * C * H * 2)           # MLP
    transcendentals = B * n_head * T * T + B * T * H                 # exp + erf
    bytes_accessed = 4 * 2 * B * T * C + weight_bytes + bias_ln_bytes

    kernel = functools.partial(_block_kernel, n_head)

    return pl.pallas_call(
        kernel,
        out_shape=jax.ShapeDtypeStruct((B, T, C), x.dtype),
        grid=grid,
        in_specs=in_specs,
        # NOTE: for C < 128 (toy shapes only) this out block stores with masked
        # lanes; at realistic C >= 128 it is a full lane-dense store, so the
        # (Bb, T*C) repack suggested for tiny C is skipped (it would just trade
        # the masked store for an in-kernel sublane->lane relayout).
        out_specs=pl.BlockSpec((Bb, T, C), lambda b: (b, 0, 0)),
        compiler_params=pltpu.CompilerParams(
            dimension_semantics=("parallel",),
            vmem_limit_bytes=vmem_limit),
        cost_estimate=pl.CostEstimate(
            flops=flops,
            transcendentals=transcendentals,
            bytes_accessed=bytes_accessed),
    )(x,
      params["ln1_g"], params["ln1_b"], wqkv, bqkv, wp, params["bp"],
      params["ln2_g"], params["ln2_b"], w1, params["b1"], w2, params["b2"])


# ---------------------------- pure-JAX reference -----------------------------
def block_reference(x, mask, params, n_head):
    def ln(h, g, b, eps=1e-5):
        mu = jnp.mean(h, axis=-1, keepdims=True)
        var = jnp.mean((h - mu) ** 2, axis=-1, keepdims=True)
        return (h - mu) / jnp.sqrt(var + eps) * g[0] + b[0]

    B, T, C = x.shape
    D = C // n_head
    h = ln(x, params["ln1_g"], params["ln1_b"])
    q = h @ params["wq"] + params["bq"][0]
    k = h @ params["wk"] + params["bk"][0]
    v = h @ params["wv"] + params["bv"][0]
    q = q.reshape(B, T, n_head, D).transpose(0, 2, 1, 3)
    k = k.reshape(B, T, n_head, D).transpose(0, 2, 1, 3)
    v = v.reshape(B, T, n_head, D).transpose(0, 2, 1, 3)
    att = jnp.einsum("bhtd,bhsd->bhts", q, k) / math.sqrt(D)
    att = jnp.where(mask[None, None] == 0.0, -jnp.inf, att)
    att = jax.nn.softmax(att, axis=-1)
    y = jnp.einsum("bhts,bhsd->bhtd", att, v)
    y = y.transpose(0, 2, 1, 3).reshape(B, T, C)
    y = y @ params["wp"] + params["bp"][0]
    x = x + y
    h2 = ln(x, params["ln2_g"], params["ln2_b"])
    m = h2 @ params["w1"] + params["b1"][0]
    m = m * 0.5 * (1.0 + jax.lax.erf(m / math.sqrt(2.0)))
    m = m @ params["w2"] + params["b2"][0]
    return x + m


if __name__ == "__main__":
    B, T, C, n_head = 2, 8, 32, 4
    H = 4 * C

    key = jax.random.PRNGKey(0)
    keys = jax.random.split(key, 13)

    # Deterministic synthetic parameters (weights stored as (in, out): y = x @ W + b).
    params = {
        "ln1_g": jnp.ones((1, C), jnp.float32),
        "ln1_b": jnp.zeros((1, C), jnp.float32),
        "ln2_g": jnp.ones((1, C), jnp.float32),
        "ln2_b": jnp.zeros((1, C), jnp.float32),
        "wq": 0.02 * jax.random.normal(keys[0], (C, C), jnp.float32),
        "bq": 0.01 * jax.random.normal(keys[1], (1, C), jnp.float32),
        "wk": 0.02 * jax.random.normal(keys[2], (C, C), jnp.float32),
        "bk": 0.01 * jax.random.normal(keys[3], (1, C), jnp.float32),
        "wv": 0.02 * jax.random.normal(keys[4], (C, C), jnp.float32),
        "bv": 0.01 * jax.random.normal(keys[5], (1, C), jnp.float32),
        "wp": 0.02 * jax.random.normal(keys[6], (C, C), jnp.float32),
        "bp": 0.01 * jax.random.normal(keys[7], (1, C), jnp.float32),
        "w1": 0.02 * jax.random.normal(keys[8], (C, H), jnp.float32),
        "b1": 0.01 * jax.random.normal(keys[9], (1, H), jnp.float32),
        "w2": 0.02 * jax.random.normal(keys[10], (H, C), jnp.float32),
        "b2": 0.01 * jax.random.normal(keys[11], (1, C), jnp.float32),
    }

    x = jax.random.normal(keys[12], (B, T, C), jnp.float32)
    # Causal mask, only used by the pure-JAX reference (the kernel builds it in-kernel).
    mask = jnp.tril(jnp.ones((T, T), jnp.float32))

    out = jax.block_until_ready(block_forward(x, params, n_head))
    ref = block_reference(x, mask, params, n_head)

    assert out.shape == (B, T, C)
    err = float(jnp.max(jnp.abs(out - ref)))
    # Tolerance accounts for bf16 MXU operands and the EUP approximate
    # reciprocal in the softmax normalization (both intentional).
    assert jnp.allclose(out, ref, atol=5e-3, rtol=5e-3), err

    print("KERNEL_OK")
</pallas_src>

<mosaic_0001>
module attributes {stable_mosaic.version = 11 : i64} {
  func.func @_block_kernel(%arg0: i32, %arg1: memref<1x8x32xf32, #tpu.memory_space<vmem>>, %arg2: memref<1x32xf32, #tpu.memory_space<vmem>>, %arg3: memref<1x32xf32, #tpu.memory_space<vmem>>, %arg4: memref<32x96xbf16, #tpu.memory_space<vmem>>, %arg5: memref<1x96xf32, #tpu.memory_space<vmem>>, %arg6: memref<32x32xbf16, #tpu.memory_space<vmem>>, %arg7: memref<1x32xf32, #tpu.memory_space<vmem>>, %arg8: memref<1x32xf32, #tpu.memory_space<vmem>>, %arg9: memref<1x32xf32, #tpu.memory_space<vmem>>, %arg10: memref<32x128xbf16, #tpu.memory_space<vmem>>, %arg11: memref<1x128xf32, #tpu.memory_space<vmem>>, %arg12: memref<128x32xbf16, #tpu.memory_space<vmem>>, %arg13: memref<1x32xf32, #tpu.memory_space<vmem>>, %arg14: memref<1x8x32xf32, #tpu.memory_space<vmem>>) attributes {dimension_semantics = [#tpu.dimension_semantics<parallel>], iteration_bounds = array<i64: 2>, scalar_prefetch = 0 : i64, scratch_operands = 0 : i64, tpu.core_type = #tpu.core_type<tc>, window_params = [{transform_indices = @transform_0, window_bounds = array<i64: 1, 8, 32>}, {pipeline_mode = #tpu.pipeline_mode<synchronous>, transform_indices = @transform_1, window_bounds = array<i64: 1, 32>}, {pipeline_mode = #tpu.pipeline_mode<synchronous>, transform_indices = @transform_2, window_bounds = array<i64: 1, 32>}, {pipeline_mode = #tpu.pipeline_mode<synchronous>, transform_indices = @transform_3, window_bounds = array<i64: 32, 96>}, {pipeline_mode = #tpu.pipeline_mode<synchronous>, transform_indices = @transform_4, window_bounds = array<i64: 1, 96>}, {pipeline_mode = #tpu.pipeline_mode<synchronous>, transform_indices = @transform_5, window_bounds = array<i64: 32, 32>}, {pipeline_mode = #tpu.pipeline_mode<synchronous>, transform_indices = @transform_6, window_bounds = array<i64: 1, 32>}, {pipeline_mode = #tpu.pipeline_mode<synchronous>, transform_indices = @transform_7, window_bounds = array<i64: 1, 32>}, {pipeline_mode = #tpu.pipeline_mode<synchronous>, transform_indices = @transform_8, window_bounds = array<i64: 1, 32>}, {pipeline_mode = #tpu.pipeline_mode<synchronous>, transform_indices = @transform_9, window_bounds = array<i64: 32, 128>}, {pipeline_mode = #tpu.pipeline_mode<synchronous>, transform_indices = @transform_10, window_bounds = array<i64: 1, 128>}, {pipeline_mode = #tpu.pipeline_mode<synchronous>, transform_indices = @transform_11, window_bounds = array<i64: 128, 32>}, {pipeline_mode = #tpu.pipeline_mode<synchronous>, transform_indices = @transform_12, window_bounds = array<i64: 1, 32>}, {transform_indices = @transform_13, window_bounds = array<i64: 1, 8, 32>}]} {
    %c0 = arith.constant 0 : index
    %c0_0 = arith.constant 0 : index
    %c0_1 = arith.constant 0 : index
    %0 = vector.load %arg1[%c0, %c0_0, %c0_1] : memref<1x8x32xf32, #tpu.memory_space<vmem>>, vector<1x8x32xf32>
    %1 = vector.shape_cast %0 : vector<1x8x32xf32> to vector<8x32xf32>
    %c0_2 = arith.constant 0 : index
    %c0_3 = arith.constant 0 : index
    %2 = vector.load %arg2[%c0_2, %c0_3] : memref<1x32xf32, #tpu.memory_space<vmem>>, vector<1x32xf32>
    %3 = vector.shape_cast %2 : vector<1x32xf32> to vector<32xf32>
    %c0_4 = arith.constant 0 : index
    %c0_5 = arith.constant 0 : index
    %4 = vector.load %arg3[%c0_4, %c0_5] : memref<1x32xf32, #tpu.memory_space<vmem>>, vector<1x32xf32>
    %5 = vector.shape_cast %4 : vector<1x32xf32> to vector<32xf32>
    %cst = arith.constant dense<0.000000e+00> : vector<8xf32>
    %6 = vector.multi_reduction <add>, %1, %cst [1] : vector<8x32xf32> to vector<8xf32>
    %7 = vector.shape_cast %6 : vector<8xf32> to vector<8x1xf32>
    %cst_6 = arith.constant 3.200000e+01 : f32
    %8 = vector.broadcast %cst_6 : f32 to vector<8x1xf32>
    %9 = arith.divf %7, %8 : vector<8x1xf32>
    %10 = vector.broadcast %9 : vector<8x1xf32> to vector<8x32xf32>
    %11 = arith.subf %1, %10 : vector<8x32xf32>
    %12 = arith.mulf %11, %11 : vector<8x32xf32>
    %cst_7 = arith.constant dense<0.000000e+00> : vector<8xf32>
    %13 = vector.multi_reduction <add>, %12, %cst_7 [1] : vector<8x32xf32> to vector<8xf32>
    %14 = vector.shape_cast %13 : vector<8xf32> to vector<8x1xf32>
    %cst_8 = arith.constant 3.200000e+01 : f32
    %15 = vector.broadcast %cst_8 : f32 to vector<8x1xf32>
    %16 = arith.divf %14, %15 : vector<8x1xf32>
    %cst_9 = arith.constant 9.99999974E-6 : f32
    %17 = vector.broadcast %cst_9 : f32 to vector<8x1xf32>
    %18 = arith.addf %16, %17 : vector<8x1xf32>
    %19 = math.rsqrt %18 : vector<8x1xf32>
    %20 = vector.broadcast %19 : vector<8x1xf32> to vector<8x32xf32>
    %21 = arith.mulf %11, %20 : vector<8x32xf32>
    %22 = vector.shape_cast %3 : vector<32xf32> to vector<1x32xf32>
    %23 = vector.broadcast %22 : vector<1x32xf32> to vector<8x32xf32>
    %24 = arith.mulf %21, %23 : vector<8x32xf32>
    %25 = vector.shape_cast %5 : vector<32xf32> to vector<1x32xf32>
    %26 = vector.broadcast %25 : vector<1x32xf32> to vector<8x32xf32>
    %27 = arith.addf %24, %26 : vector<8x32xf32>
    %28 = arith.truncf %27 : vector<8x32xf32> to vector<8x32xbf16>
    %c0_10 = arith.constant 0 : index
    %c0_11 = arith.constant 0 : index
    %29 = vector.load %arg4[%c0_10, %c0_11] : memref<32x96xbf16, #tpu.memory_space<vmem>>, vector<32x96xbf16>
    %cst_12 = arith.constant dense<0.000000e+00> : vector<8x96xf32>
    %30 = tpu.matmul %28, %29, %cst_12 {dimension_numbers = #tpu.dot_dimension_numbers<[1], [0], [0], [1], [0, 0, 1, 1], [], []>} : vector<8x32xbf16>, vector<32x96xbf16>, vector<8x96xf32> -> vector<8x96xf32>
    %c0_13 = arith.constant 0 : index
    %c0_14 = arith.constant 0 : index
    %31 = vector.load %arg5[%c0_13, %c0_14] : memref<1x96xf32, #tpu.memory_space<vmem>>, vector<1x96xf32>
    %32 = vector.shape_cast %31 : vector<1x96xf32> to vector<96xf32>
    %33 = vector.shape_cast %32 : vector<96xf32> to vector<1x96xf32>
    %34 = vector.broadcast %33 : vector<1x96xf32> to vector<8x96xf32>
    %35 = arith.addf %30, %34 : vector<8x96xf32>
    %36 = vector.extract_strided_slice %35 {offsets = [0, 0], sizes = [8, 8], strides = [1, 1]} : vector<8x96xf32> to vector<8x8xf32>
    %37 = vector.shape_cast %36 : vector<8x8xf32> to vector<1x8x8xf32>
    %38 = vector.extract_strided_slice %35 {offsets = [0, 8], sizes = [8, 8], strides = [1, 1]} : vector<8x96xf32> to vector<8x8xf32>
    %39 = vector.shape_cast %38 : vector<8x8xf32> to vector<1x8x8xf32>
    %40 = vector.extract_strided_slice %35 {offsets = [0, 16], sizes = [8, 8], strides = [1, 1]} : vector<8x96xf32> to vector<8x8xf32>
    %41 = vector.shape_cast %40 : vector<8x8xf32> to vector<1x8x8xf32>
    %42 = vector.extract_strided_slice %35 {offsets = [0, 24], sizes = [8, 8], strides = [1, 1]} : vector<8x96xf32> to vector<8x8xf32>
    %43 = vector.shape_cast %42 : vector<8x8xf32> to vector<1x8x8xf32>
    %44 = vector.shape_cast %37 : vector<1x8x8xf32> to vector<1x1x8x8xf32>
    %45 = vector.shape_cast %39 : vector<1x8x8xf32> to vector<1x1x8x8xf32>
    %46 = vector.shape_cast %41 : vector<1x8x8xf32> to vector<1x1x8x8xf32>
    %47 = vector.shape_cast %43 : vector<1x8x8xf32> to vector<1x1x8x8xf32>
    %48 = tpu.concatenate %44, %45, %46, %47 in 0 : vector<1x1x8x8xf32>, vector<1x1x8x8xf32>, vector<1x1x8x8xf32>, vector<1x1x8x8xf32> -> vector<4x1x8x8xf32>
    %49 = vector.shape_cast %48 : vector<4x1x8x8xf32> to vector<4x8x8xf32>
    %50 = arith.truncf %49 : vector<4x8x8xf32> to vector<4x8x8xbf16>
    %51 = vector.extract_strided_slice %35 {offsets = [0, 32], sizes = [8, 8], strides = [1, 1]} : vector<8x96xf32> to vector<8x8xf32>
    %52 = vector.shape_cast %51 : vector<8x8xf32> to vector<1x8x8xf32>
    %53 = vector.extract_strided_slice %35 {offsets = [0, 40], sizes = [8, 8], strides = [1, 1]} : vector<8x96xf32> to vector<8x8xf32>
    %54 = vector.shape_cast %53 : vector<8x8xf32> to vector<1x8x8xf32>
    %55 = vector.extract_strided_slice %35 {offsets = [0, 48], sizes = [8, 8], strides = [1, 1]} : vector<8x96xf32> to vector<8x8xf32>
    %56 = vector.shape_cast %55 : vector<8x8xf32> to vector<1x8x8xf32>
    %57 = vector.extract_strided_slice %35 {offsets = [0, 56], sizes = [8, 8], strides = [1, 1]} : vector<8x96xf32> to vector<8x8xf32>
    %58 = vector.shape_cast %57 : vector<8x8xf32> to vector<1x8x8xf32>
    %59 = vector.shape_cast %52 : vector<1x8x8xf32> to vector<1x1x8x8xf32>
    %60 = vector.shape_cast %54 : vector<1x8x8xf32> to vector<1x1x8x8xf32>
    %61 = vector.shape_cast %56 : vector<1x8x8xf32> to vector<1x1x8x8xf32>
    %62 = vector.shape_cast %58 : vector<1x8x8xf32> to vector<1x1x8x8xf32>
    %63 = tpu.concatenate %59, %60, %61, %62 in 0 : vector<1x1x8x8xf32>, vector<1x1x8x8xf32>, vector<1x1x8x8xf32>, vector<1x1x8x8xf32> -> vector<4x1x8x8xf32>
    %64 = vector.shape_cast %63 : vector<4x1x8x8xf32> to vector<4x8x8xf32>
    %65 = arith.truncf %64 : vector<4x8x8xf32> to vector<4x8x8xbf16>
    %66 = vector.extract_strided_slice %35 {offsets = [0, 64], sizes = [8, 8], strides = [1, 1]} : vector<8x96xf32> to vector<8x8xf32>
    %67 = vector.shape_cast %66 : vector<8x8xf32> to vector<1x8x8xf32>
    %68 = vector.extract_strided_slice %35 {offsets = [0, 72], sizes = [8, 8], strides = [1, 1]} : vector<8x96xf32> to vector<8x8xf32>
    %69 = vector.shape_cast %68 : vector<8x8xf32> to vector<1x8x8xf32>
    %70 = vector.extract_strided_slice %35 {offsets = [0, 80], sizes = [8, 8], strides = [1, 1]} : vector<8x96xf32> to vector<8x8xf32>
    %71 = vector.shape_cast %70 : vector<8x8xf32> to vector<1x8x8xf32>
    %72 = vector.extract_strided_slice %35 {offsets = [0, 88], sizes = [8, 8], strides = [1, 1]} : vector<8x96xf32> to vector<8x8xf32>
    %73 = vector.shape_cast %72 : vector<8x8xf32> to vector<1x8x8xf32>
    %74 = vector.shape_cast %67 : vector<1x8x8xf32> to vector<1x1x8x8xf32>
    %75 = vector.shape_cast %69 : vector<1x8x8xf32> to vector<1x1x8x8xf32>
    %76 = vector.shape_cast %71 : vector<1x8x8xf32> to vector<1x1x8x8xf32>
    %77 = vector.shape_cast %73 : vector<1x8x8xf32> to vector<1x1x8x8xf32>
    %78 = tpu.concatenate %74, %75, %76, %77 in 0 : vector<1x1x8x8xf32>, vector<1x1x8x8xf32>, vector<1x1x8x8xf32>, vector<1x1x8x8xf32> -> vector<4x1x8x8xf32>
    %79 = vector.shape_cast %78 : vector<4x1x8x8xf32> to vector<4x8x8xf32>
    %80 = arith.truncf %79 : vector<4x8x8xf32> to vector<4x8x8xbf16>
    %81 = tpu.iota {dimensions = array<i32: 0>} : vector<8x8xi32>
    %82 = tpu.iota {dimensions = array<i32: 1>} : vector<8x8xi32>
    %83 = arith.cmpi sge, %81, %82 : vector<8x8xi32>
    %cst_15 = arith.constant 0.000000e+00 : f32
    %cst_16 = arith.constant -1.000000e+30 : f32
    %84 = vector.broadcast %cst_15 : f32 to vector<8x8xf32>
    %85 = vector.broadcast %cst_16 : f32 to vector<8x8xf32>
    %86 = arith.select %83, %84, %85 : vector<8x8xi1>, vector<8x8xf32>
    "tpu.trace_start"() <{level = 10 : i32, message = "bqd,bkd->bqk"}> : () -> ()
    %cst_17 = arith.constant dense<0.000000e+00> : vector<4x8x8xf32>
    %87 = tpu.matmul %50, %65, %cst_17 {dimension_numbers = #tpu.dot_dimension_numbers<[2], [2], [1], [1], [0, 0, 0, 1, 1, 1], [0], [0]>} : vector<4x8x8xbf16>, vector<4x8x8xbf16>, vector<4x8x8xf32> -> vector<4x8x8xf32>
    "tpu.trace_stop"() : () -> ()
    %88 = vector.shape_cast %86 : vector<8x8xf32> to vector<1x8x8xf32>
    %89 = vector.broadcast %88 : vector<1x8x8xf32> to vector<4x8x8xf32>
    %90 = arith.addf %87, %89 : vector<4x8x8xf32>
    %cst_18 = arith.constant dense<0xFF800000> : vector<4x8xf32>
    %91 = vector.multi_reduction <maximumf>, %90, %cst_18 [2] : vector<4x8x8xf32> to vector<4x8xf32>
    %92 = vector.shape_cast %91 : vector<4x8xf32> to vector<4x8x1xf32>
    %93 = vector.broadcast %92 : vector<4x8x1xf32> to vector<4x8x8xf32>
    %94 = arith.subf %90, %93 : vector<4x8x8xf32>
    %95 = math.exp %94 : vector<4x8x8xf32>
    %cst_19 = arith.constant dense<0.000000e+00> : vector<4x8xf32>
    %96 = vector.multi_reduction <add>, %95, %cst_19 [2] : vector<4x8x8xf32> to vector<4x8xf32>
    %97 = vector.shape_cast %96 : vector<4x8xf32> to vector<4x8x1xf32>
    %98 = tpu.reciprocal %97 {approx = true} : vector<4x8x1xf32> -> vector<4x8x1xf32>
    %99 = vector.broadcast %98 : vector<4x8x1xf32> to vector<4x8x8xf32>
    %100 = arith.mulf %95, %99 : vector<4x8x8xf32>
    %101 = arith.truncf %100 : vector<4x8x8xf32> to vector<4x8x8xbf16>
    "tpu.trace_start"() <{level = 10 : i32, message = "bqk,bkd->bqd"}> : () -> ()
    %cst_20 = arith.constant dense<0.000000e+00> : vector<4x8x8xf32>
    %102 = tpu.matmul %101, %80, %cst_20 {dimension_numbers = #tpu.dot_dimension_numbers<[2], [1], [1], [2], [0, 0, 0, 1, 1, 2], [0], [0]>} : vector<4x8x8xbf16>, vector<4x8x8xbf16>, vector<4x8x8xf32> -> vector<4x8x8xf32>
    "tpu.trace_stop"() : () -> ()
    %103 = vector.extract_strided_slice %102 {offsets = [0, 0, 0], sizes = [1, 8, 8], strides = [1, 1, 1]} : vector<4x8x8xf32> to vector<1x8x8xf32>
    %104 = vector.shape_cast %103 : vector<1x8x8xf32> to vector<8x8xf32>
    %105 = vector.extract_strided_slice %102 {offsets = [1, 0, 0], sizes = [1, 8, 8], strides = [1, 1, 1]} : vector<4x8x8xf32> to vector<1x8x8xf32>
    %106 = vector.shape_cast %105 : vector<1x8x8xf32> to vector<8x8xf32>
    %107 = vector.extract_strided_slice %102 {offsets = [2, 0, 0], sizes = [1, 8, 8], strides = [1, 1, 1]} : vector<4x8x8xf32> to vector<1x8x8xf32>
    %108 = vector.shape_cast %107 : vector<1x8x8xf32> to vector<8x8xf32>
    %109 = vector.extract_strided_slice %102 {offsets = [3, 0, 0], sizes = [1, 8, 8], strides = [1, 1, 1]} : vector<4x8x8xf32> to vector<1x8x8xf32>
    %110 = vector.shape_cast %109 : vector<1x8x8xf32> to vector<8x8xf32>
    %111 = tpu.concatenate %104, %106, %108, %110 in 1 : vector<8x8xf32>, vector<8x8xf32>, vector<8x8xf32>, vector<8x8xf32> -> vector<8x32xf32>
    %112 = arith.truncf %111 : vector<8x32xf32> to vector<8x32xbf16>
    %c0_21 = arith.constant 0 : index
    %c0_22 = arith.constant 0 : index
    %113 = vector.load %arg6[%c0_21, %c0_22] : memref<32x32xbf16, #tpu.memory_space<vmem>>, vector<32x32xbf16>
    %cst_23 = arith.constant dense<0.000000e+00> : vector<8x32xf32>
    %114 = tpu.matmul %112, %113, %cst_23 {dimension_numbers = #tpu.dot_dimension_numbers<[1], [0], [0], [1], [0, 0, 1, 1], [], []>} : vector<8x32xbf16>, vector<32x32xbf16>, vector<8x32xf32> -> vector<8x32xf32>
    %c0_24 = arith.constant 0 : index
    %c0_25 = arith.constant 0 : index
    %115 = vector.load %arg7[%c0_24, %c0_25] : memref<1x32xf32, #tpu.memory_space<vmem>>, vector<1x32xf32>
    %116 = vector.shape_cast %115 : vector<1x32xf32> to vector<32xf32>
    %117 = vector.shape_cast %116 : vector<32xf32> to vector<1x32xf32>
    %118 = vector.broadcast %117 : vector<1x32xf32> to vector<8x32xf32>
    %119 = arith.addf %114, %118 : vector<8x32xf32>
    %120 = arith.addf %1, %119 : vector<8x32xf32>
    %c0_26 = arith.constant 0 : index
    %c0_27 = arith.constant 0 : index
    %121 = vector.load %arg8[%c0_26, %c0_27] : memref<1x32xf32, #tpu.memory_space<vmem>>, vector<1x32xf32>
    %122 = vector.shape_cast %121 : vector<1x32xf32> to vector<32xf32>
    %c0_28 = arith.constant 0 : index
    %c0_29 = arith.constant 0 : index
    %123 = vector.load %arg9[%c0_28, %c0_29] : memref<1x32xf32, #tpu.memory_space<vmem>>, vector<1x32xf32>
    %124 = vector.shape_cast %123 : vector<1x32xf32> to vector<32xf32>
    %cst_30 = arith.constant dense<0.000000e+00> : vector<8xf32>
    %125 = vector.multi_reduction <add>, %120, %cst_30 [1] : vector<8x32xf32> to vector<8xf32>
    %126 = vector.shape_cast %125 : vector<8xf32> to vector<8x1xf32>
    %cst_31 = arith.constant 3.200000e+01 : f32
    %127 = vector.broadcast %cst_31 : f32 to vector<8x1xf32>
    %128 = arith.divf %126, %127 : vector<8x1xf32>
    %129 = vector.broadcast %128 : vector<8x1xf32> to vector<8x32xf32>
    %130 = arith.subf %120, %129 : vector<8x32xf32>
    %131 = arith.mulf %130, %130 : vector<8x32xf32>
    %cst_32 = arith.constant dense<0.000000e+00> : vector<8xf32>
    %132 = vector.multi_reduction <add>, %131, %cst_32 [1] : vector<8x32xf32> to vector<8xf32>
    %133 = vector.shape_cast %132 : vector<8xf32> to vector<8x1xf32>
    %cst_33 = arith.constant 3.200000e+01 : f32
    %134 = vector.broadcast %cst_33 : f32 to vector<8x1xf32>
    %135 = arith.divf %133, %134 : vector<8x1xf32>
    %cst_34 = arith.constant 9.99999974E-6 : f32
    %136 = vector.broadcast %cst_34 : f32 to vector<8x1xf32>
    %137 = arith.addf %135, %136 : vector<8x1xf32>
    %138 = math.rsqrt %137 : vector<8x1xf32>
    %139 = vector.broadcast %138 : vector<8x1xf32> to vector<8x32xf32>
    %140 = arith.mulf %130, %139 : vector<8x32xf32>
    %141 = vector.shape_cast %122 : vector<32xf32> to vector<1x32xf32>
    %142 = vector.broadcast %141 : vector<1x32xf32> to vector<8x32xf32>
    %143 = arith.mulf %140, %142 : vector<8x32xf32>
    %144 = vector.shape_cast %124 : vector<32xf32> to vector<1x32xf32>
    %145 = vector.broadcast %144 : vector<1x32xf32> to vector<8x32xf32>
    %146 = arith.addf %143, %145 : vector<8x32xf32>
    %147 = arith.truncf %146 : vector<8x32xf32> to vector<8x32xbf16>
    %c0_35 = arith.constant 0 : index
    %c0_36 = arith.constant 0 : index
    %148 = vector.load %arg10[%c0_35, %c0_36] : memref<32x128xbf16, #tpu.memory_space<vmem>>, vector<32x128xbf16>
    %cst_37 = arith.constant dense<0.000000e+00> : vector<8x128xf32>
    %149 = tpu.matmul %147, %148, %cst_37 {dimension_numbers = #tpu.dot_dimension_numbers<[1], [0], [0], [1], [0, 0, 1, 1], [], []>} : vector<8x32xbf16>, vector<32x128xbf16>, vector<8x128xf32> -> vector<8x128xf32>
    %c0_38 = arith.constant 0 : index
    %c0_39 = arith.constant 0 : index
    %150 = vector.load %arg11[%c0_38, %c0_39] : memref<1x128xf32, #tpu.memory_space<vmem>>, vector<1x128xf32>
    %151 = vector.shape_cast %150 : vector<1x128xf32> to vector<128xf32>
    %152 = vector.shape_cast %151 : vector<128xf32> to vector<1x128xf32>
    %153 = vector.broadcast %152 : vector<1x128xf32> to vector<8x128xf32>
    %154 = arith.addf %149, %153 : vector<8x128xf32>
    %cst_40 = arith.constant 5.000000e-01 : f32
    %155 = vector.broadcast %cst_40 : f32 to vector<8x128xf32>
    %156 = arith.mulf %154, %155 : vector<8x128xf32>
    %cst_41 = arith.constant 0.707106769 : f32
    %157 = vector.broadcast %cst_41 : f32 to vector<8x128xf32>
    %158 = arith.mulf %154, %157 : vector<8x128xf32>
    %159 = math.erf %158 : vector<8x128xf32>
    %cst_42 = arith.constant 1.000000e+00 : f32
    %160 = vector.broadcast %cst_42 : f32 to vector<8x128xf32>
    %161 = arith.addf %160, %159 : vector<8x128xf32>
    %162 = arith.mulf %156, %161 : vector<8x128xf32>
    %163 = arith.truncf %162 : vector<8x128xf32> to vector<8x128xbf16>
    %c0_43 = arith.constant 0 : index
    %c0_44 = arith.constant 0 : index
    %164 = vector.load %arg12[%c0_43, %c0_44] : memref<128x32xbf16, #tpu.memory_space<vmem>>, vector<128x32xbf16>
    %cst_45 = arith.constant dense<0.000000e+00> : vector<8x32xf32>
    %165 = tpu.matmul %163, %164, %cst_45 {dimension_numbers = #tpu.dot_dimension_numbers<[1], [0], [0], [1], [0, 0, 1, 1], [], []>} : vector<8x128xbf16>, vector<128x32xbf16>, vector<8x32xf32> -> vector<8x32xf32>
    %c0_46 = arith.constant 0 : index
    %c0_47 = arith.constant 0 : index
    %166 = vector.load %arg13[%c0_46, %c0_47] : memref<1x32xf32, #tpu.memory_space<vmem>>, vector<1x32xf32>
    %167 = vector.shape_cast %166 : vector<1x32xf32> to vector<32xf32>
    %168 = vector.shape_cast %167 : vector<32xf32> to vector<1x32xf32>
    %169 = vector.broadcast %168 : vector<1x32xf32> to vector<8x32xf32>
    %170 = arith.addf %165, %169 : vector<8x32xf32>
    %171 = arith.addf %120, %170 : vector<8x32xf32>
    %172 = vector.shape_cast %171 : vector<8x32xf32> to vector<1x8x32xf32>
    %c0_48 = arith.constant 0 : index
    %c0_49 = arith.constant 0 : index
    %c0_50 = arith.constant 0 : index
    %173 = vector.load %arg14[%c0_48, %c0_49, %c0_50] : memref<1x8x32xf32, #tpu.memory_space<vmem>>, vector<1x8x32xf32>
    tpu.vector_store %arg14[%c0_48, %c0_49, %c0_50], %172 {strides = array<i32>} : memref<1x8x32xf32, #tpu.memory_space<vmem>>, vector<1x8x32xf32>,
    return
  }
  func.func @transform_0(%arg0: i32) -> (i32, i32, i32) {
    %c0_i32 = arith.constant 0 : i32
    %c0_i32_0 = arith.constant 0 : i32
    %c0_i32_1 = arith.constant 0 : i32
    return %arg0, %c0_i32, %c0_i32_0 : i32, i32, i32
  }
  func.func @transform_1(%arg0: i32) -> (i32, i32) {
    %c0_i32 = arith.constant 0 : i32
    %c0_i32_0 = arith.constant 0 : i32
    %c0_i32_1 = arith.constant 0 : i32
    return %c0_i32, %c0_i32_0 : i32, i32
  }
  func.func @transform_2(%arg0: i32) -> (i32, i32) {
    %c0_i32 = arith.constant 0 : i32
    %c0_i32_0 = arith.constant 0 : i32
    %c0_i32_1 = arith.constant 0 : i32
    return %c0_i32, %c0_i32_0 : i32, i32
  }
  func.func @transform_3(%arg0: i32) -> (i32, i32) {
    %c0_i32 = arith.constant 0 : i32
    %c0_i32_0 = arith.constant 0 : i32
    %c0_i32_1 = arith.constant 0 : i32
    return %c0_i32, %c0_i32_0 : i32, i32
  }
  func.func @transform_4(%arg0: i32) -> (i32, i32) {
    %c0_i32 = arith.constant 0 : i32
    %c0_i32_0 = arith.constant 0 : i32
    %c0_i32_1 = arith.constant 0 : i32
    return %c0_i32, %c0_i32_0 : i32, i32
  }
  func.func @transform_5(%arg0: i32) -> (i32, i32) {
    %c0_i32 = arith.constant 0 : i32
    %c0_i32_0 = arith.constant 0 : i32
    %c0_i32_1 = arith.constant 0 : i32
    return %c0_i32, %c0_i32_0 : i32, i32
  }
  func.func @transform_6(%arg0: i32) -> (i32, i32) {
    %c0_i32 = arith.constant 0 : i32
    %c0_i32_0 = arith.constant 0 : i32
    %c0_i32_1 = arith.constant 0 : i32
    return %c0_i32, %c0_i32_0 : i32, i32
  }
  func.func @transform_7(%arg0: i32) -> (i32, i32) {
    %c0_i32 = arith.constant 0 : i32
    %c0_i32_0 = arith.constant 0 : i32
    %c0_i32_1 = arith.constant 0 : i32
    return %c0_i32, %c0_i32_0 : i32, i32
  }
  func.func @transform_8(%arg0: i32) -> (i32, i32) {
    %c0_i32 = arith.constant 0 : i32
    %c0_i32_0 = arith.constant 0 : i32
    %c0_i32_1 = arith.constant 0 : i32
    return %c0_i32, %c0_i32_0 : i32, i32
  }
  func.func @transform_9(%arg0: i32) -> (i32, i32) {
    %c0_i32 = arith.constant 0 : i32
    %c0_i32_0 = arith.constant 0 : i32
    %c0_i32_1 = arith.constant 0 : i32
    return %c0_i32, %c0_i32_0 : i32, i32
  }
  func.func @transform_10(%arg0: i32) -> (i32, i32) {
    %c0_i32 = arith.constant 0 : i32
    %c0_i32_0 = arith.constant 0 : i32
    %c0_i32_1 = arith.constant 0 : i32
    return %c0_i32, %c0_i32_0 : i32, i32
  }
  func.func @transform_11(%arg0: i32) -> (i32, i32) {
    %c0_i32 = arith.constant 0 : i32
    %c0_i32_0 = arith.constant 0 : i32
    %c0_i32_1 = arith.constant 0 : i32
    return %c0_i32, %c0_i32_0 : i32, i32
  }
  func.func @transform_12(%arg0: i32) -> (i32, i32) {
    %c0_i32 = arith.constant 0 : i32
    %c0_i32_0 = arith.constant 0 : i32
    %c0_i32_1 = arith.constant 0 : i32
    return %c0_i32, %c0_i32_0 : i32, i32
  }
  func.func @transform_13(%arg0: i32) -> (i32, i32, i32) {
    %c0_i32 = arith.constant 0 : i32
    %c0_i32_0 = arith.constant 0 : i32
    %c0_i32_1 = arith.constant 0 : i32
    return %arg0, %c0_i32, %c0_i32_0 : i32, i32, i32
  }
}

</mosaic_0001>

<bundles_post_ra>
// kernel: tpu_custom_call.1
= control target key start
LH: loop header
LB: loop body
LE: loop exit
PB: predicated region body
PF: predicated region fallthrough
CT: control target
= control target key end

     0   :  { %s2047_s0 = inlined_call_operand.vmem [shape: f32[2,8,32], index: 0, kind: input, shape index: {}]   ;;  %s2048_s1 = inlined_call_operand.vmem [shape: f32[1,32], index: 1, kind: input, shape index: {}]   ;;  %s2049_s2 = inlined_call_operand.vmem [shape: f32[1,32], index: 2, kind: input, shape index: {}]   ;;  %s2050_s3 = inlined_call_operand.vmem [shape: bf16[32,96], index: 3, kind: input, shape index: {}]   ;;  %s2051_s4 = inlined_call_operand.vmem [shape: f32[1,96], index: 4, kind: input, shape index: {}]   ;;  %s2052_s5 = inlined_call_operand.vmem [shape: bf16[32,32], index: 5, kind: input, shape index: {}]   ;;  %s2053_s6 = inlined_call_operand.vmem [shape: f32[1,32], index: 6, kind: input, shape index: {}]   ;;  %s2054_s7 = inlined_call_operand.vmem [shape: f32[1,32], index: 7, kind: input, shape index: {}]   ;;  %s2055_s8 = inlined_call_operand.vmem [shape: f32[1,32], index: 8, kind: input, shape index: {}]   ;;  %s2056_s9 = inlined_call_operand.vmem [shape: bf16[32,128], index: 9, kind: input, shape index: {}]   ;;  %s2057_s10 = inlined_call_operand.vmem [shape: f32[1,128], index: 10, kind: input, shape index: {}]   ;;  %s2058_s11 = inlined_call_operand.vmem [shape: bf16[128,32], index: 11, kind: input, shape index: {}]   ;;  %s2059_s12 = inlined_call_operand.vmem [shape: f32[1,32], index: 12, kind: input, shape index: {}]   ;;  %s2060_s13 = inlined_call_operand.hbm [shape: f32[2,8,32], index: 13, kind: output, shape index: {}]  }
   0x1   :  { %2061 = sst [smem:[#allocation5_spill]] %s2047_s0 }
   0x2   :  { %2062 = sst [smem:[#allocation6_spill]] %s2048_s1 }
   0x3   :  { %2063 = sst [smem:[#allocation7_spill]] %s2049_s2 }
   0x4   :  { %18 = vsyncpa [#allocation3], 0 }
   0x5   :  { %20 = vsyncpa [#allocation3 + $0x1], 0  ;;  %s1768_s25 = smov 0   ;;  %s1770_s26 = smov 0  }
   0x6   :  { %s1772_s27 = smov 0   ;;  %s1774_s28 = smov 0  }
   0x7 LB: > { %s1789_s29 = sadd.s32 4294967295, %s1684_s28   ;;  %s1367_s30 = sadd.s32 4294967294, %s1684_s28   ;;  %s1684_s28 = sphi %s1774_s28, %s2072_s28   ;;  %s1680_s27 = sphi %s1772_s27, %s2071_s27   ;;  %s1676_s26 = sphi %s1770_s26, %s2070_s26   ;;  %s1672_s25 = sphi %s1768_s25, %s2069_s25  }
   0x8   : > { %s1793_s14 = sadd.s32 1, %s1684_s28   ;;  %s311_s15 = sadd.s32 1, %s1680_s27 }
   0x9   : > { %s308_s16 = ssub.s32 %s1684_s28, %s1793_s14  ;;  %p321_p0 = scmp.ne.s32.totalorder %s1680_s27, %s1676_s26 }
   0xa   : > { %p309_p1 = scmp.eq.s32.totalorder %s308_s16, 0  ;;  %p322_p2 = scmp.eq.s32.totalorder %s1789_s29, 1 }
   0xb   : > { %p327_p3 = scmp.ne.s32.totalorder %s1676_s26, %s1672_s25  ;;  %p328_p4 = scmp.eq.s32.totalorder %s1367_s30, 1 }
   0xc   : > { %s1804_s17 = scalar_select %p309_p1, %s1680_s27, %s311_s15  }
   0xd   : > { %p1806_p5 = por %p322_p2, %p321_p0  ;;  %p1810_p6 = por %p328_p4, %p327_p3 }
   0xe   : > { %p1370_p7 = scmp.ge.s32.totalorder %s1684_s28, 1  ;;  %p389_p8 = scmp.lt.s32.totalorder %s1684_s28, 3 }
  0x10   : > { %p390_p9 = pnand %p1370_p7, %p389_p8 }
  0x11   : > { %p432_p10 = scmp.lt.s32.totalorder (!%p390_p9), %s1789_s29, 1  ;;  %vm440_vm0 = vcmask (!%p390_p9), 261120   ;;  %s2066_s0 = sld [smem:[#allocation5_spill]] (!%p390_p9)  ;;  %v1586_v7 = vld [vmem:[%s2050_s3] sm:$0xff] (!%p390_p9)   ;;  %v1686_v8 = vmov (!%p390_p9), 0.0   ;;  %vm1687_vm1 = vmmov (!%p390_p9), 0   ;;  %v550_v41 = vlaneseq (!%p390_p9) }
  0x12   : > { %393 = sbr.rel (%p390_p9) target bundleno = 2662 (0xa66), region = 72  ;;  %1444 = vmatprep.subr.bf16.mxu0 (!%p390_p9), %v1686_v8  ;;  %1448 = vmatprep.mubr.msk.bf16.mxu0 (!%p390_p9), %vm1687_vm1, %v1686_v8  ;;  %v1587_v9 = vld [vmem:[%s2050_s3 + $0x8] sm:$0xff] (!%p390_p9)   ;;  %s2067_s1 = sld [smem:[#allocation6_spill]] (!%p390_p9)  ;;  %v1375_v20 = vld [vmem:[%s2051_s4] ss:$0 sm:$0xff] (!%p390_p9)  ;;  %vm559_vm2 = vcmask (!%p390_p9), 64512  }
  0x13   : > { %1445 = vmatpush3.bf16.msra.mxu0 (!%p390_p9), %v1586_v7  ;;  %1464 = vmatprep.subr.bf16.mxu1 (!%p390_p9), %v1686_v8  ;;  %s2068_s2 = sld [smem:[#allocation7_spill]] (!%p390_p9)  ;;  %s1688_s16 = smov (!%p390_p9), 104   ;;  %v551_v42 = vshrl.u32 (!%p390_p9), %v550_v41, 7  ;;  %v553_v43 = vand.u32 (!%p390_p9), 127, %v550_v41  ;;  %v1692_v44 = vmov (!%p390_p9), -1e+30  }
  0x14   : > { %1446 = vmatprep.subr.bf16.mxu0 (!%p390_p9), %v1686_v8  ;;  %1466 = vmatprep.mubr.msk.bf16.mxu1 (!%p390_p9), %vm1687_vm1, %v1686_v8  ;;  %s1691_s22 = smov (!%p390_p9), 96   ;;  %s1693_s23 = smov (!%p390_p9), 64   ;;  %vm806_vm4 = vcmask (!%p390_p9), 1043456   ;;  %vm1007_vm5 = vcmask (!%p390_p9), 130048   ;;  %vm1009_vm6 = vcmask (!%p390_p9), 195584  }
  0x15   : > { %vm554_vm3 = vcmp.ge.s32.totalorder (!%p390_p9), %v551_v42, %v553_v43 }
  0x16   : > { %v555_v45 = vsel (!%p390_p9), %vm554_vm3, 0.0, %v1692_v44 }
  0x17   : > { %1447 = vmatpush3.bf16.msra.mxu0 (!%p390_p9), %v1587_v9 }
  0x18   : > { %1452 = vmatprep.subr.bf16.mxu0 (!%p390_p9), %v1686_v8  ;;  %v1373_v14 = vld [vmem:[%s2067_s1] ss:$0 sm:$0xff] (!%p390_p9) }
  0x19   : > { %s433_s20 = scalar_select %p432_p10, %s1789_s29, 1  ;;  %v1374_v16 = vld [vmem:[%s2068_s2] ss:$0 sm:$0xff] }
  0x1b   : > { %s1372_s21 = sshll.u32 %s433_s20, 3  ;;  %s1689_s20 = smov 120  }
  0x1c   : > { %s435_s24 = scalar_lea.vmem %s2066_s0, %s1372_s21  ;;  %s1690_s21 = smov 112  }
  0x1d   : > { %v1821_v0 = vld [vmem:[%s435_s24] sm:$0xff] }
  0x1e   : > { %v441_v1 = vsel %vm440_vm0, %v1821_v0, 0.0 }
  0x1f   : > { %442 = vadd.xlane.f32.xlu0 %v441_v1 }
  0xac   : > { %v443_v2 = vpop.xlane.xlu0 %442 }
  0xad   : > { %v445_v3 = vmul.f32 0.03125, %v443_v2 }
  0xaf   : > { %v446_v4 = vsub.f32 %v1821_v0, %v445_v3 }
  0xb1   : > { %v447_v5 = vmul.f32 %v446_v4, %v446_v4 }
  0xb3   : > { %v448_v6 = vsel %vm440_vm0, %v447_v5, 0.0 }
  0xb4   : > { %449 = vadd.xlane.f32.xlu0 %v448_v6 }
 0x141   : > { %v450_v10 = vpop.xlane.xlu0 %449 }
 0x142   : > { %v451_v11 = vmul.f32 0.03125, %v450_v10 }
 0x144   : > { %v452_v12 = vadd.f32 1e-05, %v451_v11 }
 0x146   : > { %1600 = vrsqrt.f32 %v452_v12 }
 0x150   : > { %v1601_v13 = vpop.eup %1600 }
 0x151   : > { %v454_v15 = vmul.f32 %v1601_v13, %v446_v4 }
 0x153   : > { %v461_v17 = vmul.f32 %v1373_v14, %v454_v15 }
 0x155   : > { %v468_v18 = vadd.f32 %v1374_v16, %v461_v17 }
 0x157   : > { %v469_v19 = vpack.c.bf16 %v468_v18, %v468_v18 }
 0x159   : > { %1449 = vmatmul.mubr.msk.bf16.vlgmr.msra.gmra.mrb[0].mxu0 %vm440_vm0, %v469_v19 }
 0x15a   : > { %1454 = vmatprep.mubr.msk.bf16.mxu0 %vm1687_vm1, %v1686_v8 }
 0x22c   : > { %v530_v21 = vpop.f32.mrb[0].mxu0 }
 0x22d   : > { %v531_v22 = vadd.f32 %v1375_v20, %v530_v21  ;;  %v1450_v23 = vpop.f32.mrb[1].mxu0 }
 0x22e   : > { %v533_v24 = vpop.f32.mrb[2].mxu0 }
 0x22f   : > { %543 = vrot.lane.b32.xlu0 %v531_v22, %s1688_s16  ;;  %537 = vrot.lane.b32.xlu1 %v531_v22, %s1689_s20  ;;  %v1451_v25 = vpop.f32.mrb[3].mxu0  ;;  %v1853_v26 = vpack.c.bf16 %v531_v22, %v531_v22  ;;  %s1694_s20 = smov 8   ;;  %s429_s16 = sand.u32 1, %s1676_s26  }
 0x233   : > { %540 = vrot.lane.b32.xlu1 %v531_v22, %s1690_s21  ;;  %s1695_s21 = smov 16  }
 0x237   : > { %557 = vrot.lane.b32.xlu1 %v1853_v26, %s1691_s22 }
 0x2a1   : > { %v538_v27 = vpop.permute.xlu1 %537  ;;  %v544_v31 = vpop.permute.xlu0 %543 }
 0x2a2   : > { %v1856_v28 = vpack.c.bf16 %v538_v27, %v538_v27  ;;  %v1862_v33 = vpack.c.bf16 %v544_v31, %v544_v31 }
 0x2a4   : > { %607 = vrot.lane.b32.xlu1 %v1856_v28, %s1691_s22 }
 0x2a5   : > { %v541_v29 = vpop.permute.xlu1 %540 }
 0x2a6   : > { %v1859_v30 = vpack.c.bf16 %v541_v29, %v541_v29 }
 0x2a8   : > { %656 = vrot.lane.b32.xlu1 %v1859_v30, %s1691_s22 }
 0x2a9   : > { %v558_v32 = vpop.permute.xlu1 %557 }
 0x2aa   : > { %v564_v34 = vsel %vm559_vm2, %v558_v32, 0 }
 0x2ab   : > { %1453 = vmatpush3.bf16.xpose.msra.mxu0 %v564_v34 }
 0x2ac   : > { %705 = vrot.lane.b32.xlu1 %v1862_v33, %s1691_s22  ;;  %1458 = vmatprep.subr.bf16.mxu0 %v1686_v8  ;;  %s1696_s22 = smov 24  }
 0x2b2   : > { %1455 = vmatmul.mubr.msk.bf16.vlgmr.msra.gmra.mrb[4].mxu0 %vm559_vm2, %v1853_v26 }
 0x2b3   : > { %1460 = vmatprep.mubr.msk.bf16.mxu0 %vm1687_vm1, %v1686_v8 }
 0x316   : > { %v608_v35 = vpop.permute.xlu1 %607 }
 0x317   : > { %v613_v36 = vsel %vm559_vm2, %v608_v35, 0 }
 0x318   : > { %1459 = vmatpush3.bf16.xpose.msra.mxu0 %v613_v36 }
 0x319   : > { %1470 = vmatprep.subr.bf16.mxu0 %v1686_v8 }
 0x31a   : > { %v657_v37 = vpop.permute.xlu1 %656 }
 0x31b   : > { %v662_v38 = vsel %vm559_vm2, %v657_v37, 0 }
 0x31c   : > { %1465 = vmatpush3.bf16.xpose.msra.mxu1 %v662_v38 }
 0x31d   : > { %1476 = vmatprep.subr.bf16.mxu1 %v1686_v8 }
 0x31e   : > { %v706_v39 = vpop.permute.xlu1 %705 }
 0x31f   : > { %v711_v40 = vsel %vm559_vm2, %v706_v39, 0  ;;  %1461 = vmatmul.mubr.msk.bf16.vlgmr.msra.gmra.mrb[8].mxu0 %vm559_vm2, %v1856_v28 }
 0x320   : > { %1471 = vmatpush3.bf16.xpose.msra.mxu0 %v711_v40  ;;  %1472 = vmatprep.mubr.msk.bf16.mxu0 %vm1687_vm1, %v1686_v8 }
 0x321   : > { %1482 = vmatprep.subr.bf16.mxu0 %v1686_v8 }
 0x323   : > { %1467 = vmatmul.mubr.msk.bf16.vlgmr.msra.gmra.mrb[0].mxu1 %vm559_vm2, %v1859_v30 }
 0x324   : > { %1478 = vmatprep.mubr.msk.bf16.mxu1 %vm1687_vm1, %v1686_v8 }
 0x327   : > { %1473 = vmatmul.mubr.msk.bf16.vlgmr.msra.gmra.mrb[12].mxu0 %vm559_vm2, %v1862_v33 }
 0x328   : > { %1484 = vmatprep.mubr.msk.bf16.mxu0 %vm1687_vm1, %v1686_v8 }
 0x385   : > { %v600_v46 = vpop.f32.mrb[4].mxu0 }
 0x386   : > { %v601_v47 = vadd.f32 %v600_v46, %v555_v45  ;;  %v1456_v48 = vpop.f32.mrb[5].mxu0 }
 0x387   : > { %v603_v49 = vpop.f32.mrb[6].mxu0 }
 0x388   : > { %v1457_v50 = vpop.f32.mrb[7].mxu0  ;;  %v753_v51 = vsel %vm559_vm2, %v601_v47, -inf }
 0x389   : > { %754 = vmax.xlane.f32.xlu1 %v753_v51 }
 0x3f2   : > { %v649_v52 = vpop.f32.mrb[8].mxu0 }
 0x3f3   : > { %v650_v53 = vadd.f32 %v649_v52, %v555_v45  ;;  %v1462_v54 = vpop.f32.mrb[9].mxu0 }
 0x3f4   : > { %v652_v55 = vpop.f32.mrb[10].mxu0 }
 0x3f5   : > { %v1463_v56 = vpop.f32.mrb[11].mxu0  ;;  %v756_v57 = vsel %vm559_vm2, %v650_v53, -inf }
 0x3f6   : > { %v698_v58 = vpop.f32.mrb[0].mxu1  ;;  %757 = vmax.xlane.f32.xlu0 %v756_v57  ;;  %v1588_v56 = vld [vmem:[%s2052_s5] sm:$0xff]   ;;  %v1589_v57 = vld [vmem:[%s2052_s5 + $0x8] sm:$0xff]  }
 0x3f7   : > { %v699_v59 = vadd.f32 %v698_v58, %v555_v45  ;;  %v1468_v60 = vpop.f32.mrb[1].mxu1 }
 0x3f8   : > { %v701_v61 = vpop.f32.mrb[2].mxu1 }
 0x3f9   : > { %v1469_v62 = vpop.f32.mrb[3].mxu1  ;;  %v759_v63 = vsel %vm559_vm2, %v699_v59, -inf }
 0x3fa   : > { %760 = vmax.xlane.f32.xlu1 %v759_v63  ;;  %v747_v1 = vpop.f32.mrb[12].mxu0 }
 0x3fb   : > { %v748_v2 = vadd.f32 %v747_v1, %v555_v45  ;;  %v1474_v3 = vpop.f32.mrb[13].mxu0 }
 0x3fc   : > { %v750_v4 = vpop.f32.mrb[14].mxu0 }
 0x3fd   : > { %v1475_v5 = vpop.f32.mrb[15].mxu0  ;;  %v762_v6 = vsel %vm559_vm2, %v748_v2, -inf }
 0x3fe   : > { %763 = vmax.xlane.f32.xlu0 %v762_v6 }
 0x40b   : > { %801 = vrot.lane.b32.xlu1 %v1853_v26, %s1693_s23 }
 0x416   : > { %v755_v7 = vpop.xlane.xlu1 %754 }
 0x417   : > { %v765_v9 = vsub.f32 %v601_v47, %v755_v7 }
 0x419   : > { %v769_v10 = vmul.f32 1.442695, %v765_v9 }
 0x41b   : > { %1602 = vpow2.f32 %v769_v10 }
 0x425   : > { %v1603_v11 = vpop.eup %1602 }
 0x426   : > { %v777_v12 = vsel %vm559_vm2, %v1603_v11, 0.0 }
 0x42f   : > { %778 = vadd.xlane.f32.xlu1 %v777_v12 }
 0x483   : > { %v758_v13 = vpop.xlane.xlu0 %757 }
 0x484   : > { %v766_v14 = vsub.f32 %v650_v53, %v758_v13 }
 0x486   : > { %v771_v15 = vmul.f32 1.442695, %v766_v14 }
 0x487   : > { %v761_v16 = vpop.xlane.xlu1 %760 }
 0x488   : > { %1604 = vpow2.f32 %v771_v15  ;;  %v767_v17 = vsub.f32 %v699_v59, %v761_v16  ;;  %v1387_v15 = vld [vmem:[%s2053_s6] ss:$0 sm:$0xff] }
 0x48a   : > { %v773_v18 = vmul.f32 1.442695, %v767_v17 }
 0x48b   : > { %v802_v19 = vpop.permute.xlu1 %801  ;;  %v764_v20 = vpop.xlane.xlu0 %763 }
 0x48c   : > { %1606 = vpow2.f32 %v773_v18  ;;  %v808_v21 = vsel %vm806_vm4, %v802_v19, 0  ;;  %v768_v22 = vsub.f32 %v748_v2, %v764_v20 }
 0x48d   : > { %1477 = vmatpush3.bf16.msra.mxu1 %v808_v21 }
 0x48e   : > { %v775_v23 = vmul.f32 1.442695, %v768_v22  ;;  %1488 = vmatprep.subr.bf16.mxu1 %v1686_v8 }
 0x490   : > { %1608 = vpow2.f32 %v775_v23 }
 0x492   : > { %v1605_v24 = vpop.eup %1604 }
 0x493   : > { %v780_v25 = vsel %vm559_vm2, %v1605_v24, 0.0 }
 0x494   : > { %781 = vadd.xlane.f32.xlu0 %v780_v25 }
 0x496   : > { %v1607_v26 = vpop.eup %1606 }
 0x497   : > { %v783_v27 = vsel %vm559_vm2, %v1607_v26, 0.0 }
 0x498   : > { %784 = vadd.xlane.f32.xlu1 %v783_v27 }
 0x49a   : > { %v1609_v29 = vpop.eup %1608 }
 0x49b   : > { %v786_v31 = vsel %vm559_vm2, %v1609_v29, 0.0 }
 0x49c   : > { %787 = vadd.xlane.f32.xlu0 %v786_v31  ;;  %v1592_v31 = vld [vmem:[%s2058_s11] sm:$0xff]  }
 0x4a9   : > { %898 = vrot.lane.b32.xlu1 %v1859_v30, %s1693_s23 }
 0x4ad   : > { %946 = vrot.lane.b32.xlu1 %v1862_v33, %s1693_s23 }
 0x4b2   : > { %850 = vrot.lane.b32.xlu0 %v1856_v28, %s1693_s23  ;;  %s1407_s23 = sshll.u32 %s1789_s29, 7  ;;  %s1295_s29 = scalar_lea.sflag [#allocation3], %s429_s16 }
 0x4b3   : > { %s2004_s1 = scalar_lea.hbm %s2060_s13, %s1407_s23 }
 0x4bc   : > { %v779_v32 = vpop.xlane.xlu1 %778 }
 0x4bd   : > { %1610 = vrcp.f32 %v779_v32  ;;  %v1593_v32 = vld [vmem:[%s2058_s11 + $0x8] sm:$0xff]  }
 0x4c7   : > { %v1611_v34 = vpop.eup %1610 }
 0x4c8   : > { %v793_v35 = vmul.f32 %v1611_v34, %v1603_v11  ;;  %v1594_v34 = vld [vmem:[%s2058_s11 + $0x10] sm:$0xff]  }
 0x4ca   : > { %v797_v36 = vpack.c.bf16 %v793_v35, %v793_v35 }
 0x4cc   : > { %1479 = vmatmul.mubr.msk.bf16.vlgmr.msra.gmra.mrb[4].mxu1 %vm559_vm2, %v797_v36 }
 0x4cd   : > { %1490 = vmatprep.mubr.msk.bf16.mxu1 %vm1687_vm1, %v1686_v8 }
 0x521   : > { %v782_v37 = vpop.xlane.xlu0 %781 }
 0x522   : > { %1612 = vrcp.f32 %v782_v37 }
 0x525   : > { %v785_v38 = vpop.xlane.xlu1 %784 }
 0x526   : > { %1614 = vrcp.f32 %v785_v38 }
 0x529   : > { %v899_v30 = vpop.permute.xlu1 %898  ;;  %v788_v39 = vpop.xlane.xlu0 %787 }
 0x52a   : > { %v904_v33 = vsel %vm806_vm4, %v899_v30, 0  ;;  %1616 = vrcp.f32 %v788_v39  ;;  %v1391_v30 = vld [vmem:[%s2054_s7] ss:$0 sm:$0xff] }
 0x52b   : > { %1489 = vmatpush3.bf16.msra.mxu1 %v904_v33  ;;  %v1392_v33 = vld [vmem:[%s2055_s8] ss:$0 sm:$0xff] }
 0x52c   : > { %v1613_v28 = vpop.eup %1612  ;;  %1500 = vmatprep.subr.bf16.mxu1 %v1686_v8 }
 0x52d   : > { %v794_v40 = vmul.f32 %v1613_v28, %v1605_v24  ;;  %v851_v41 = vpop.permute.xlu0 %850  ;;  %v947_v43 = vpop.permute.xlu1 %946 }
 0x52e   : > { %v856_v42 = vsel %vm806_vm4, %v851_v41, 0  ;;  %v952_v47 = vsel %vm806_vm4, %v947_v43, 0  ;;  %v1596_v43 = vld [vmem:[%s2058_s11 + $0x20] sm:$0xff]  }
 0x52f   : > { %1483 = vmatpush3.bf16.msra.mxu0 %v856_v42  ;;  %v798_v44 = vpack.c.bf16 %v794_v40, %v794_v40  ;;  %v1595_v42 = vld [vmem:[%s2058_s11 + $0x18] sm:$0xff]  }
 0x530   : > { %v1615_v45 = vpop.eup %1614  ;;  %1494 = vmatprep.subr.bf16.mxu0 %v1686_v8 }
 0x531   : > { %v795_v46 = vmul.f32 %v1615_v45, %v1607_v26  ;;  %v1598_v45 = vld [vmem:[%s2058_s11 + $0x30] sm:$0xff]  }
 0x532   : > { %1485 = vmatmul.mubr.msk.bf16.vlgmr.msra.gmra.mrb[16].mxu0 %vm559_vm2, %v798_v44  ;;  %v1597_v44 = vld [vmem:[%s2058_s11 + $0x28] sm:$0xff]  }
 0x533   : > { %1495 = vmatpush3.bf16.msra.mxu0 %v952_v47  ;;  %v799_v48 = vpack.c.bf16 %v795_v46, %v795_v46  ;;  %1496 = vmatprep.mubr.msk.bf16.mxu0 %vm1687_vm1, %v1686_v8  ;;  %v1599_v46 = vld [vmem:[%s2058_s11 + $0x38] sm:$0xff]   ;;  %v1393_v47 = vld [vmem:[%s2057_s10] ss:$0 sm:$0xff] }
 0x534   : > { %v1617_v49 = vpop.eup %1616  ;;  %1508 = vmatprep.subr.bf16.mxu0 %v1686_v8 }
 0x535   : > { %v796_v50 = vmul.f32 %v1617_v49, %v1609_v29  ;;  %1491 = vmatmul.mubr.msk.bf16.vlgmr.msra.gmra.mrb[8].mxu1 %vm559_vm2, %v799_v48  ;;  %v1590_v29 = vld [vmem:[%s2056_s9] sm:$0xff]  }
 0x536   : > { %1504 = vmatprep.mubr.msk.bf16.mxu1 %vm1687_vm1, %v1686_v8  ;;  %1501 = vmatpush3.bf16.msra.mxu1 %v1588_v56 }
 0x537   : > { %v800_v51 = vpack.c.bf16 %v796_v50, %v796_v50  ;;  %1502 = vmatprep.subr.bf16.mxu1 %v1686_v8 }
 0x53a   : > { %1497 = vmatmul.mubr.msk.bf16.vlgmr.msra.gmra.mrb[20].mxu0 %vm559_vm2, %v800_v51  ;;  %1503 = vmatpush3.bf16.msra.mxu1 %v1589_v57 }
 0x53b   : > { %1512 = vmatprep.mubr.msk.bf16.mxu0 %vm1687_vm1, %v1686_v8  ;;  %1516 = vmatprep.subr.bf16.mxu1 %v1686_v8 }
 0x53c   : > { %1509 = vmatpush3.bf16.msra.mxu0 %v1590_v29 }
 0x53d   : > { %1510 = vmatprep.subr.bf16.mxu0 %v1686_v8 }
 0x59f   : > { %v844_v52 = vpop.f32.mrb[4].mxu1 }
 0x5a0   : > { %v1480_v53 = vpop.f32.mrb[5].mxu1 }
 0x5a1   : > { %v847_v54 = vpop.f32.mrb[6].mxu1 }
 0x5a2   : > { %v1481_v55 = vpop.f32.mrb[7].mxu1 }
 0x605   : > { %v892_v58 = vpop.f32.mrb[16].mxu0 }
 0x606   : > { %995 = vrot.lane.b32.xlu0 %v892_v58, %s1694_s20  ;;  %v1486_v59 = vpop.f32.mrb[17].mxu0  ;;  %s1371_s20 = sshll.u32 %s429_s16, 3  ;;  %v1397_v58 = vld [vmem:[%s2059_s12] ss:$0 sm:$0xff] }
 0x607   : > { %v895_v60 = vpop.f32.mrb[18].mxu0  ;;  %s431_s24 = scalar_lea.vmem [#allocation2], %s1371_s20 }
 0x608   : > { %v1487_v61 = vpop.f32.mrb[19].mxu0  ;;  %v940_v62 = vpop.f32.mrb[8].mxu1  ;;  %s1308_s30 = sshll.u32 %s431_s24, 4  ;;  %s2006_s30 = int_to_ptr.vmem [resolvable:$true] %s1308_s30 }
 0x609   : > { %999 = vrot.lane.b32.xlu1 %v940_v62, %s1695_s21  ;;  %v1492_v63 = vpop.f32.mrb[9].mxu1  ;;  %s1622_s20 = scalar_lea.vmem %s2006_s30, 128  ;;  %s1697_s21 = smov [#allocation2]  }
 0x60a   : > { %v943_v1 = vpop.f32.mrb[10].mxu1  ;;  %p1623_p11 = scmp.ne.s32.totalorder %s2006_s30, %s1622_s20 }
 0x60b   : > { %v1493_v2 = vpop.f32.mrb[11].mxu1 }
 0x60c   : > { %p1624_p12 = pnand %p1623_p11, %p1806_p5 }
 0x60d   : > { %v988_v3 = vpop.f32.mrb[20].mxu0 }
 0x60e   : > { %1003 = vrot.lane.b32.xlu0 %v988_v3, %s1696_s22  ;;  %v1498_v4 = vpop.f32.mrb[21].mxu0  ;;  %p1625_p13 = pneg %p1624_p12  ;;  %s1626_s22 = sshll.u32 %s1697_s21, 4  ;;  %s1627_s22 = int_to_ptr.vmem [resolvable:$false] %s1626_s22 }
 0x60f   : > { %v991_v5 = vpop.f32.mrb[22].mxu0  ;;  %s1628_s2 = scalar_lea.vmem %s1627_s22, 256  ;;  %p1629_p0 = scmp.lt.s32.totalorder %s2006_s30, %s1627_s22 }
 0x610   : > { %v1499_v6 = vpop.f32.mrb[23].mxu0  ;;  %p1630_p1 = scmp.lt.s32.totalorder %s1628_s2, %s1622_s20 }
 0x612   : > { %p1631_p2 = por %p1630_p1, %p1629_p0 }
 0x614   : > { %p1632_p3 = pnand %p1631_p2, %p1625_p13 }
 0x678   : > { %v996_v7 = vpop.permute.xlu0 %995 }
 0x679   : > { %v1006_v10 = vsel %vm559_vm2, %v844_v52, %v996_v7 }
 0x67b   : > { %v1000_v9 = vpop.permute.xlu1 %999 }
 0x67c   : > { %v1008_v11 = vsel %vm1007_vm5, %v1006_v10, %v1000_v9 }
 0x680   : > { %v1004_v12 = vpop.permute.xlu0 %1003 }
 0x681   : > { %v1010_v13 = vsel %vm1009_vm6, %v1008_v11, %v1004_v12 }
 0x682   : > { %v1011_v14 = vpack.c.bf16 %v1010_v13, %v1010_v13 }
 0x684   : > { %1505 = vmatmul.mubr.msk.bf16.vlgmr.msra.gmra.mrb[12].mxu1 %vm440_vm0, %v1011_v14 }
 0x685   : > { %1532 = vmatprep.mubr.msk.bf16.mxu1 %vm1687_vm1, %v1686_v8  ;;  %1517 = vmatpush3.bf16.msra.mxu1 %v1592_v31 }
 0x686   : > { %1518 = vmatprep.subr.bf16.mxu1 %v1686_v8 }
 0x689   : > { %1519 = vmatpush3.bf16.msra.mxu1 %v1593_v32 }
 0x68a   : > { %1520 = vmatprep.subr.bf16.mxu1 %v1686_v8 }
 0x68d   : > { %1521 = vmatpush3.bf16.msra.mxu1 %v1594_v34 }
 0x68e   : > { %1522 = vmatprep.subr.bf16.mxu1 %v1686_v8 }
 0x691   : > { %1523 = vmatpush3.bf16.msra.mxu1 %v1595_v42 }
 0x692   : > { %1524 = vmatprep.subr.bf16.mxu1 %v1686_v8 }
 0x695   : > { %1525 = vmatpush3.bf16.msra.mxu1 %v1596_v43 }
 0x696   : > { %1526 = vmatprep.subr.bf16.mxu1 %v1686_v8 }
 0x699   : > { %1527 = vmatpush3.bf16.msra.mxu1 %v1597_v44 }
 0x69a   : > { %1528 = vmatprep.subr.bf16.mxu1 %v1686_v8 }
 0x69d   : > { %1529 = vmatpush3.bf16.msra.mxu1 %v1598_v45 }
 0x69e   : > { %1530 = vmatprep.subr.bf16.mxu1 %v1686_v8 }
 0x6a1   : > { %1531 = vmatpush3.bf16.msra.mxu1 %v1599_v46 }
 0x757   : > { %v1072_v16 = vpop.f32.mrb[12].mxu1 }
 0x758   : > { %v1073_v17 = vadd.f32 %v1387_v15, %v1072_v16  ;;  %v1506_v18 = vpop.f32.mrb[13].mxu1 }
 0x759   : > { %v1075_v19 = vpop.f32.mrb[14].mxu1 }
 0x75a   : > { %v1941_v20 = vadd.f32 %v1073_v17, %v1821_v0  ;;  %v1507_v21 = vpop.f32.mrb[15].mxu1  ;;  %v1591_v0 = vld [vmem:[%s2056_s9 + $0x8] sm:$0xff]  }
 0x75b   : > { %1511 = vmatpush3.bf16.msra.mxu0 %v1591_v0 }
 0x75c   : > { %v1081_v22 = vsel %vm440_vm0, %v1941_v20, 0.0 }
 0x75d   : > { %1082 = vadd.xlane.f32.xlu1 %v1081_v22 }
 0x7ea   : > { %v1083_v23 = vpop.xlane.xlu1 %1082 }
 0x7eb   : > { %v1084_v24 = vmul.f32 0.03125, %v1083_v23 }
 0x7ed   : > { %v1085_v25 = vsub.f32 %v1941_v20, %v1084_v24 }
 0x7ef   : > { %v1086_v26 = vmul.f32 %v1085_v25, %v1085_v25 }
 0x7f1   : > { %v1087_v27 = vsel %vm440_vm0, %v1086_v26, 0.0 }
 0x7f2   : > { %1088 = vadd.xlane.f32.xlu0 %v1087_v27 }
 0x87f   : > { %v1089_v35 = vpop.xlane.xlu0 %1088 }
 0x880   : > { %v1090_v36 = vmul.f32 0.03125, %v1089_v35 }
 0x882   : > { %v1091_v37 = vadd.f32 1e-05, %v1090_v36 }
 0x884   : > { %1618 = vrsqrt.f32 %v1091_v37 }
 0x88e   : > { %v1619_v38 = vpop.eup %1618 }
 0x88f   : > { %v1093_v39 = vmul.f32 %v1619_v38, %v1085_v25 }
 0x891   : > { %v1100_v28 = vmul.f32 %v1391_v30, %v1093_v39 }
 0x893   : > { %v1107_v40 = vadd.f32 %v1392_v33, %v1100_v28 }
 0x895   : > { %v1108_v41 = vpack.c.bf16 %v1107_v40, %v1107_v40 }
 0x897   : > { %1513 = vmatmul.mubr.msk.bf16.vlgmr.msra.gmra.mrb[24].mxu0 %vm440_vm0, %v1108_v41 }
 0x96a   : > { %v1169_v48 = vpop.f32.mrb[24].mxu0 }
 0x96b   : > { %v1170_v49 = vadd.f32 %v1393_v47, %v1169_v48  ;;  %v1514_v50 = vpop.f32.mrb[25].mxu0 }
 0x96c   : > { %v1172_v51 = vpop.f32.mrb[26].mxu0 }
 0x96d   : > { %v1176_v52 = vmul.f32 0.70710677, %v1170_v49  ;;  %v1515_v53 = vpop.f32.mrb[27].mxu0  ;;  %v1175_v8 = vmul.f32 0.5, %v1170_v49 }
 0x96f   : > { %1620 = verf.f32 %v1176_v52 }
 0x979   : > { %v1621_v54 = vpop.eup %1620 }
 0x97a   : > { %v1178_v55 = vadd.f32 1.0, %v1621_v54 }
 0x97c   : > { %v1179_v56 = vmul.f32 %v1178_v55, %v1175_v8 }
 0x97e   : > { %v1180_v57 = vpack.c.bf16 %v1179_v56, %v1179_v56 }
 0x980   : > { %1533 = vmatmul.mubr.bf16.vlgmr.msra.gmra.mrb[16].mxu1 %v1180_v57 }
 0xa53   : > { %v1286_v59 = vpop.f32.mrb[16].mxu1 }
 0xa54   : > { %v1287_v60 = vadd.f32 %v1397_v58, %v1286_v59  ;;  %v1534_v61 = vpop.f32.mrb[17].mxu1 }
 0xa55   : > { %v1289_v62 = vpop.f32.mrb[18].mxu1 }
 0xa56   : > { %v1292_v63 = vadd.f32 %v1287_v60, %v1941_v20  ;;  %v1535_v1 = vpop.f32.mrb[19].mxu1 }
 0xa58   : > { %1293 = vst.msk [vmem:[%s431_s24] sm:$0xff] %vm440_vm0, %v1292_v63 }
 0xa59   : > { %1635 = shalt.err (!%p1632_p3)
}
 0xa5a   : > { %s1636_s0 = scalar_lea.hbm %s2004_s1, 128  ;;  %s1640_s24 = scalar_lea.hbm %s2060_s13, 256 }
 0xa5b   : > { %p1637_p4 = scmp.ne.s32.totalorder %s2004_s1, %s1636_s0  ;;  %p1641_p9 = scmp.lt.u32.totalorder %s2004_s1, %s2060_s13 }
 0xa5c   : > { %p1642_p10 = scmp.lt.u32.totalorder %s1640_s24, %s1636_s0  ;;  %p1644_p12 = scmp.lt.u32.totalorder %s1636_s0, %s2004_s1 }
 0xa5d   : > { %p1638_p7 = pnand %p1637_p4, %p1806_p5 }
 0xa5e   : > { %p1643_p11 = por %p1642_p10, %p1641_p9 }
 0xa5f   : > { %p1639_p8 = pneg %p1638_p7 }
 0xa60   : > { %p1645_p13 = por %p1644_p12, %p1643_p11 }
 0xa62   : > { %p1646_p0 = pnand %p1645_p13, %p1639_p8 }
 0xa64   : > { %1649 = shalt.err (!%p1646_p0)
}
 0xa65   : > { %1536 = dma.vmem_to_hbm [thread:$0]  (%p1806_p5), %s2006_s30, 128, %s2004_s1, %s1295_s29  }
 0xa66 PF: > { %p1542_p1 = scmp.ge.s32.totalorder %s1684_s28, 2  ;;  %s1320_s2 = sand.u32 1, %s1672_s25  }
 0xa67   : > { %s1321_s20 = scalar_lea.sflag [#allocation3], %s1320_s2 }
 0xa68   : > { %p1539_p2 = pnand %p1542_p1, %p1810_p6 }
 0xa6a   : > { %1667 = dma.done.wait (!%p1539_p2), %s1321_s20, 128  }
 0xa6b   : > { %1669 = vsyncadd (!%p1539_p2), %s1321_s20, 4294967168  ;;  %p23_p3 = scmp.ge.s32.totalorder %s1793_s14, 4   ;;  %s2069_s25 = smov %s1676_s26 }
 0xa6c   : > { %s2070_s26 = smov %s1680_s27  ;;  %s2071_s27 = smov %s1804_s17 }
 0xa6d   : > { %s2072_s28 = smov %s1793_s14  ;;  %25 = sbr.rel (!%p23_p3) target bundleno = 7 (0x7), region = 107 }
 0xa74   :  { %1326 = vsyncpa [#allocation3], 1 }
 0xa75   :  { %1328 = vsyncpa [#allocation3 + $0x1], 1 }

</bundles_post_ra>
